<compile_context>
chip_gen: v5e
topology: v5e:2x2
jax: 0.10.0
libtpu: 0.0.40
codegen_flags: <defaults>
</compile_context>

<pallas_src>
import functools
import math

import jax
import jax.numpy as jnp
from jax.experimental import pallas as pl
from jax.experimental.pallas import tpu as pltpu


def _round_up(x, m):
    return (x + m - 1) // m * m


def _pick_batch_tile(batch, seq, step_bytes, budget):
    """Batch tile: ~1024 rows/step, >=2 grid steps, within the VMEM budget."""
    target_rows = 1024
    bt = max(1, min(batch, target_rows // max(seq, 1)))
    if batch >= 2:                       # v7x megacore: keep >= 2 grid steps
        bt = min(bt, max(1, batch // 2))
    while batch % bt != 0:               # keep every block fully in-bounds
        bt -= 1
    while bt > 1 and step_bytes(bt) > budget:
        bt -= 1
        while batch % bt != 0:
            bt -= 1
    return bt


def _head_attention_kernel(*refs, mode, dkp, dvp):
    """mode: 0 = distinct q/k/v, 1 = key is value, 2 = query is key is value."""
    w_ref, b_ref, o_ref = refs[-3], refs[-2], refs[-1]
    act_refs = refs[:-3]
    bt, seq, dinp = act_refs[0].shape
    cdt = jnp.bfloat16  # MXU input dtype; accumulate in f32.

    w = w_ref[...]      # (dinp, 2*dkp + dvp) bf16, pre-transposed/padded/scaled
    b = b_ref[...]      # (1,    2*dkp + dvp) f32

    # Flattening the batch tile fills the MXU M dimension; only do it when the
    # reshape is a free view (bf16 sublane tile = 16).
    flatten_ok = (bt == 1) or (seq % 16 == 0)

    def proj(x3d, wc, bc):
        if flatten_ok:
            y = jnp.dot(x3d.reshape(bt * seq, dinp), wc,
                        preferred_element_type=jnp.float32)
            y = y.reshape(bt, seq, wc.shape[1])
        else:
            y = jnp.einsum("bsd,df->bsf", x3d, wc,
                           preferred_element_type=jnp.float32)
        return y + bc   # bc (1, n) broadcasts over (bt, seq, n)

    if mode == 2:
        # query is key is value: one matmul against the full fused slab.
        qkv = proj(act_refs[0][...], w, b)
        qb = qkv[..., :dkp]
        kb = qkv[..., dkp:2 * dkp]
        vb = qkv[..., 2 * dkp:]
    elif mode == 1:
        # key is value: fuse the K/V projections (N = dkp + dvp).
        qb = proj(act_refs[0][...], w[:, :dkp], b[:, :dkp])
        kv = proj(act_refs[1][...], w[:, dkp:], b[:, dkp:])
        kb = kv[..., :dkp]
        vb = kv[..., dkp:]
    else:
        qb = proj(act_refs[0][...], w[:, :dkp], b[:, :dkp])
        kb = proj(act_refs[1][...], w[:, dkp:2 * dkp], b[:, dkp:2 * dkp])
        vb = proj(act_refs[2][...], w[:, 2 * dkp:], b[:, 2 * dkp:])

    qb = qb.astype(cdt)
    kb = kb.astype(cdt)
    vb = vb.astype(cdt)

    # Scaled dot-product attention; 1/sqrt(dim_k) is already folded into Wq/bq.
    s = jnp.einsum("bqd,bkd->bqk", qb, kb, preferred_element_type=jnp.float32)
    m = jnp.max(s, axis=-1, keepdims=True)
    e = jnp.exp(s - m)
    denom = jnp.sum(e, axis=-1, keepdims=True)        # (bt, S, 1)

    out = jnp.einsum("bqk,bkd->bqd", e.astype(cdt), vb,
                     preferred_element_type=jnp.float32)
    # Deferred normalization: (bt,S,dvp) multiplies instead of (bt,S,S).
    out = out * pl.reciprocal(denom, approx=True)
    o_ref[...] = out.astype(o_ref.dtype)   # lane-dense (dvp multiple of 128)


def head_attention(query, key, value, wq, bq, wk, bk, wv, bv, *, block_b=None):
    """query/key/value: [B, S, dim_in]; weights PyTorch-style [out, in]."""
    B, S, dim_in = query.shape
    dim_k = wq.shape[0]
    dim_v = wv.shape[0]

    dkp = _round_up(dim_k, 128)
    dvp = _round_up(dim_v, 128)
    dinp = _round_up(dim_in, 128)
    ncols = 2 * dkp + dvp
    scale = 1.0 / math.sqrt(dim_k)

    # --- one-time parameter layout (ideally done at parameter-load time) ---
    # Transpose to [in, out], fold the softmax scale into the Q block, zero-pad
    # in-features (MXU contraction depth) and out-features (lanes), fuse into
    # one bf16 slab -> one weight DMA, lane-aligned static slices in-kernel.
    def prep_w(w_oi, out_p, s_=1.0):
        wt = w_oi.T * s_
        return jnp.pad(wt, ((0, dinp - dim_in), (0, out_p - wt.shape[1])))

    w_all = jnp.concatenate(
        [prep_w(wq, dkp, scale), prep_w(wk, dkp), prep_w(wv, dvp)], axis=1
    ).astype(jnp.bfloat16)                              # (dinp, ncols)
    b_all = jnp.concatenate([
        jnp.pad(bq * scale, (0, dkp - dim_k)),
        jnp.pad(bk, (0, dkp - dim_k)),
        jnp.pad(bv, (0, dvp - dim_v)),
    ]).reshape(1, ncols).astype(jnp.float32)

    # Dedupe aliased activation inputs (self-attention / shared K,V).
    if query is key and key is value:
        mode, acts = 2, [query]
    elif key is value:
        mode, acts = 1, [query, key]
    else:
        mode, acts = 0, [query, key, value]

    # bf16 activations + zero-padded contraction dim (mathematically inert).
    def prep_act(x):
        x = jnp.pad(x, ((0, 0), (0, 0), (0, dinp - dim_in)))
        return x.astype(jnp.bfloat16)

    acts = [prep_act(x) for x in acts]
    out_itemsize = jnp.dtype(query.dtype).itemsize

    # Per-step VMEM footprint estimate (conservative: double-buffered weights).
    def step_bytes(bt):
        rows = bt * S
        act_b = len(acts) * 2 * rows * dinp * 2          # bf16, double-buffered
        wgt_b = 2 * dinp * ncols * 2 + 2 * ncols * 4     # weight slab + bias
        out_b = 2 * rows * dvp * out_itemsize
        proj_b = rows * ncols * 4                        # f32 Q/K/V
        score_b = bt * S * S * (4 + 4 + 2)               # s, e (f32) + p (bf16)
        attn_b = rows * dvp * 4
        return act_b + wgt_b + out_b + proj_b + score_b + attn_b

    budget = 40 * 1024 * 1024          # leaves headroom inside v7x's 64 MiB
    bt = block_b if block_b is not None else _pick_batch_tile(B, S, step_bytes, budget)
    vmem_limit = int(min(64 * 1024 * 1024,
                         max(32 * 1024 * 1024, step_bytes(bt) * 3 // 2)))

    act_spec = pl.BlockSpec((bt, S, dinp), lambda b: (b, 0, 0))
    out_spec = pl.BlockSpec((bt, S, dvp), lambda b: (b, 0, 0))

    def const_specs(single_buffer):
        kw = {"pipeline_mode": pl.Buffered(1)} if single_buffer else {}
        return [
            pl.BlockSpec((dinp, ncols), lambda b: (0, 0), **kw),
            pl.BlockSpec((1, ncols), lambda b: (0, 0), **kw),
        ]

    kernel = functools.partial(_head_attention_kernel, mode=mode, dkp=dkp, dvp=dvp)

    def run(single_buffer_weights):
        r = pl.pallas_call(
            kernel,
            out_shape=jax.ShapeDtypeStruct((B, S, dvp), query.dtype),
            grid_spec=pltpu.PrefetchScalarGridSpec(
                num_scalar_prefetch=0,
                grid=(B // bt,),
                in_specs=[act_spec] * len(acts) + const_specs(single_buffer_weights),
                out_specs=out_spec,
            ),
            compiler_params=pltpu.CompilerParams(
                dimension_semantics=("parallel",),
                vmem_limit_bytes=vmem_limit),
        )(*acts, w_all, b_all)
        return r.block_until_ready()

    try:
        # Weight/bias index never changes: single-buffer them (halves their VMEM).
        out_padded = run(True)
    except Exception:
        # pl.Buffered(1) not supported by this jax version -> default buffering.
        out_padded = run(False)

    # Drop the lane padding of the value head dim.
    return out_padded[..., :dim_v]


if __name__ == "__main__":
    # Small, deterministic example shapes.
    B, S, dim_in, dim_k, dim_v = 2, 8, 32, 16, 32

    root = jax.random.PRNGKey(0)
    kq, kk, kv, kwq, kbq, kwk, kbk, kwv, kbv = jax.random.split(root, 9)

    query = jax.random.normal(kq, (B, S, dim_in), dtype=jnp.float32)
    key = jax.random.normal(kk, (B, S, dim_in), dtype=jnp.float32)
    value = jax.random.normal(kv, (B, S, dim_in), dtype=jnp.float32)

    # nn.Linear-style parameters: weight [out, in], bias [out].
    def linear_init(wkey, bkey, out_f, in_f):
        bound = 1.0 / math.sqrt(in_f)
        w = jax.random.uniform(wkey, (out_f, in_f), jnp.float32, -bound, bound)
        b = jax.random.uniform(bkey, (out_f,), jnp.float32, -bound, bound)
        return w, b

    wq, bq = linear_init(kwq, kbq, dim_k, dim_in)
    wk, bk = linear_init(kwk, kbk, dim_k, dim_in)
    wv, bv = linear_init(kwv, kbv, dim_v, dim_in)

    # Pure-JAX f32 reference of the same math (kernel uses bf16 MXU inputs and
    # an approx reciprocal, hence the loosened tolerance).
    def ref(q, k, v):
        Q = q @ wq.T + bq
        K = k @ wk.T + bk
        V = v @ wv.T + bv
        scores = jnp.einsum("bqd,bkd->bqk", Q, K) / math.sqrt(dim_k)
        p = jax.nn.softmax(scores, axis=-1)
        return jnp.einsum("bqk,bkd->bqd", p, V)

    ok = True

    # Distinct q/k/v (mode 0).
    out = jax.block_until_ready(
        head_attention(query, key, value, wq, bq, wk, bk, wv, bv))
    assert out.shape == (B, S, dim_v)
    ok &= bool(jnp.allclose(out, ref(query, key, value), atol=5e-2, rtol=5e-2))

    # key is value (mode 1, fused K/V projection).
    out_kv = jax.block_until_ready(
        head_attention(query, key, key, wq, bq, wk, bk, wv, bv))
    ok &= bool(jnp.allclose(out_kv, ref(query, key, key), atol=5e-2, rtol=5e-2))

    # query is key is value (mode 2, single fused QKV projection).
    out_sh = jax.block_until_ready(
        head_attention(query, query, query, wq, bq, wk, bk, wv, bv))
    ok &= bool(jnp.allclose(out_sh, ref(query, query, query), atol=5e-2, rtol=5e-2))

    assert ok
    print("KERNEL_OK")
</pallas_src>

<mosaic_0001>
module attributes {stable_mosaic.version = 11 : i64} {
  func.func @_head_attention_kernel(%arg0: i32, %arg1: memref<1x8x128xbf16, #tpu.memory_space<vmem>>, %arg2: memref<1x8x128xbf16, #tpu.memory_space<vmem>>, %arg3: memref<1x8x128xbf16, #tpu.memory_space<vmem>>, %arg4: memref<128x384xbf16, #tpu.memory_space<vmem>>, %arg5: memref<1x384xf32, #tpu.memory_space<vmem>>, %arg6: memref<1x8x128xf32, #tpu.memory_space<vmem>>) attributes {dimension_semantics = [#tpu.dimension_semantics<parallel>], iteration_bounds = array<i64: 2>, scalar_prefetch = 0 : i64, scratch_operands = 0 : i64, tpu.core_type = #tpu.core_type<tc>, window_params = [{transform_indices = @transform_0, window_bounds = array<i64: 1, 8, 128>}, {transform_indices = @transform_1, window_bounds = array<i64: 1, 8, 128>}, {transform_indices = @transform_2, window_bounds = array<i64: 1, 8, 128>}, {pipeline_mode = #tpu.pipeline_mode<synchronous>, transform_indices = @transform_3, window_bounds = array<i64: 128, 384>}, {pipeline_mode = #tpu.pipeline_mode<synchronous>, transform_indices = @transform_4, window_bounds = array<i64: 1, 384>}, {transform_indices = @transform_5, window_bounds = array<i64: 1, 8, 128>}]} {
    %c0 = arith.constant 0 : index
    %c0_0 = arith.constant 0 : index
    %0 = vector.load %arg4[%c0, %c0_0] : memref<128x384xbf16, #tpu.memory_space<vmem>>, vector<128x384xbf16>
    %c0_1 = arith.constant 0 : index
    %c0_2 = arith.constant 0 : index
    %1 = vector.load %arg5[%c0_1, %c0_2] : memref<1x384xf32, #tpu.memory_space<vmem>>, vector<1x384xf32>
    %c0_3 = arith.constant 0 : index
    %c0_4 = arith.constant 0 : index
    %c0_5 = arith.constant 0 : index
    %2 = vector.load %arg1[%c0_3, %c0_4, %c0_5] : memref<1x8x128xbf16, #tpu.memory_space<vmem>>, vector<1x8x128xbf16>
    %3 = vector.extract_strided_slice %0 {offsets = [0, 0], sizes = [128, 128], strides = [1, 1]} : vector<128x384xbf16> to vector<128x128xbf16>
    %4 = vector.extract_strided_slice %1 {offsets = [0, 0], sizes = [1, 128], strides = [1, 1]} : vector<1x384xf32> to vector<1x128xf32>
    %5 = vector.shape_cast %2 : vector<1x8x128xbf16> to vector<8x128xbf16>
    %cst = arith.constant dense<0.000000e+00> : vector<8x128xf32>
    %6 = tpu.matmul %5, %3, %cst {dimension_numbers = #tpu.dot_dimension_numbers<[1], [0], [0], [1], [0, 0, 1, 1], [], []>} : vector<8x128xbf16>, vector<128x128xbf16>, vector<8x128xf32> -> vector<8x128xf32>
    %7 = vector.shape_cast %6 : vector<8x128xf32> to vector<1x8x128xf32>
    %8 = vector.shape_cast %4 : vector<1x128xf32> to vector<1x1x128xf32>
    %9 = vector.broadcast %8 : vector<1x1x128xf32> to vector<1x8x128xf32>
    %10 = arith.addf %7, %9 : vector<1x8x128xf32>
    %c0_6 = arith.constant 0 : index
    %c0_7 = arith.constant 0 : index
    %c0_8 = arith.constant 0 : index
    %11 = vector.load %arg2[%c0_6, %c0_7, %c0_8] : memref<1x8x128xbf16, #tpu.memory_space<vmem>>, vector<1x8x128xbf16>
    %12 = vector.extract_strided_slice %0 {offsets = [0, 128], sizes = [128, 128], strides = [1, 1]} : vector<128x384xbf16> to vector<128x128xbf16>
    %13 = vector.extract_strided_slice %1 {offsets = [0, 128], sizes = [1, 128], strides = [1, 1]} : vector<1x384xf32> to vector<1x128xf32>
    %14 = vector.shape_cast %11 : vector<1x8x128xbf16> to vector<8x128xbf16>
    %cst_9 = arith.constant dense<0.000000e+00> : vector<8x128xf32>
    %15 = tpu.matmul %14, %12, %cst_9 {dimension_numbers = #tpu.dot_dimension_numbers<[1], [0], [0], [1], [0, 0, 1, 1], [], []>} : vector<8x128xbf16>, vector<128x128xbf16>, vector<8x128xf32> -> vector<8x128xf32>
    %16 = vector.shape_cast %15 : vector<8x128xf32> to vector<1x8x128xf32>
    %17 = vector.shape_cast %13 : vector<1x128xf32> to vector<1x1x128xf32>
    %18 = vector.broadcast %17 : vector<1x1x128xf32> to vector<1x8x128xf32>
    %19 = arith.addf %16, %18 : vector<1x8x128xf32>
    %c0_10 = arith.constant 0 : index
    %c0_11 = arith.constant 0 : index
    %c0_12 = arith.constant 0 : index
    %20 = vector.load %arg3[%c0_10, %c0_11, %c0_12] : memref<1x8x128xbf16, #tpu.memory_space<vmem>>, vector<1x8x128xbf16>
    %21 = vector.extract_strided_slice %0 {offsets = [0, 256], sizes = [128, 128], strides = [1, 1]} : vector<128x384xbf16> to vector<128x128xbf16>
    %22 = vector.extract_strided_slice %1 {offsets = [0, 256], sizes = [1, 128], strides = [1, 1]} : vector<1x384xf32> to vector<1x128xf32>
    %23 = vector.shape_cast %20 : vector<1x8x128xbf16> to vector<8x128xbf16>
    %cst_13 = arith.constant dense<0.000000e+00> : vector<8x128xf32>
    %24 = tpu.matmul %23, %21, %cst_13 {dimension_numbers = #tpu.dot_dimension_numbers<[1], [0], [0], [1], [0, 0, 1, 1], [], []>} : vector<8x128xbf16>, vector<128x128xbf16>, vector<8x128xf32> -> vector<8x128xf32>
    %25 = vector.shape_cast %24 : vector<8x128xf32> to vector<1x8x128xf32>
    %26 = vector.shape_cast %22 : vector<1x128xf32> to vector<1x1x128xf32>
    %27 = vector.broadcast %26 : vector<1x1x128xf32> to vector<1x8x128xf32>
    %28 = arith.addf %25, %27 : vector<1x8x128xf32>
    %29 = arith.truncf %10 : vector<1x8x128xf32> to vector<1x8x128xbf16>
    %30 = arith.truncf %19 : vector<1x8x128xf32> to vector<1x8x128xbf16>
    %31 = arith.truncf %28 : vector<1x8x128xf32> to vector<1x8x128xbf16>
    "tpu.trace_start"() <{level = 10 : i32, message = "bqd,bkd->bqk"}> : () -> ()
    %cst_14 = arith.constant dense<0.000000e+00> : vector<1x8x8xf32>
    %32 = tpu.matmul %29, %30, %cst_14 {dimension_numbers = #tpu.dot_dimension_numbers<[2], [2], [1], [1], [0, 0, 0, 1, 1, 1], [0], [0]>} : vector<1x8x128xbf16>, vector<1x8x128xbf16>, vector<1x8x8xf32> -> vector<1x8x8xf32>
    "tpu.trace_stop"() : () -> ()
    %cst_15 = arith.constant dense<0xFF800000> : vector<1x8xf32>
    %33 = vector.multi_reduction <maximumf>, %32, %cst_15 [2] : vector<1x8x8xf32> to vector<1x8xf32>
    %34 = vector.shape_cast %33 : vector<1x8xf32> to vector<1x8x1xf32>
    %35 = vector.broadcast %34 : vector<1x8x1xf32> to vector<1x8x8xf32>
    %36 = arith.subf %32, %35 : vector<1x8x8xf32>
    %37 = math.exp %36 : vector<1x8x8xf32>
    %cst_16 = arith.constant dense<0.000000e+00> : vector<1x8xf32>
    %38 = vector.multi_reduction <add>, %37, %cst_16 [2] : vector<1x8x8xf32> to vector<1x8xf32>
    %39 = vector.shape_cast %38 : vector<1x8xf32> to vector<1x8x1xf32>
    %40 = arith.truncf %37 : vector<1x8x8xf32> to vector<1x8x8xbf16>
    "tpu.trace_start"() <{level = 10 : i32, message = "bqk,bkd->bqd"}> : () -> ()
    %cst_17 = arith.constant dense<0.000000e+00> : vector<1x8x128xf32>
    %41 = tpu.matmul %40, %31, %cst_17 {dimension_numbers = #tpu.dot_dimension_numbers<[2], [1], [1], [2], [0, 0, 0, 1, 1, 2], [0], [0]>} : vector<1x8x8xbf16>, vector<1x8x128xbf16>, vector<1x8x128xf32> -> vector<1x8x128xf32>
    "tpu.trace_stop"() : () -> ()
    %42 = tpu.reciprocal %39 {approx = true} : vector<1x8x1xf32> -> vector<1x8x1xf32>
    %43 = vector.broadcast %42 : vector<1x8x1xf32> to vector<1x8x128xf32>
    %44 = arith.mulf %41, %43 : vector<1x8x128xf32>
    %c0_18 = arith.constant 0 : index
    %c0_19 = arith.constant 0 : index
    %c0_20 = arith.constant 0 : index
    %45 = vector.load %arg6[%c0_18, %c0_19, %c0_20] : memref<1x8x128xf32, #tpu.memory_space<vmem>>, vector<1x8x128xf32>
    tpu.vector_store %arg6[%c0_18, %c0_19, %c0_20], %44 {strides = array<i32>} : memref<1x8x128xf32, #tpu.memory_space<vmem>>, vector<1x8x128xf32>,
    return
  }
  func.func @transform_0(%arg0: i32) -> (i32, i32, i32) {
    %c0_i32 = arith.constant 0 : i32
    %c0_i32_0 = arith.constant 0 : i32
    %c0_i32_1 = arith.constant 0 : i32
    return %arg0, %c0_i32, %c0_i32_0 : i32, i32, i32
  }
  func.func @transform_1(%arg0: i32) -> (i32, i32, i32) {
    %c0_i32 = arith.constant 0 : i32
    %c0_i32_0 = arith.constant 0 : i32
    %c0_i32_1 = arith.constant 0 : i32
    return %arg0, %c0_i32, %c0_i32_0 : i32, i32, i32
  }
  func.func @transform_2(%arg0: i32) -> (i32, i32, i32) {
    %c0_i32 = arith.constant 0 : i32
    %c0_i32_0 = arith.constant 0 : i32
    %c0_i32_1 = arith.constant 0 : i32
    return %arg0, %c0_i32, %c0_i32_0 : i32, i32, i32
  }
  func.func @transform_3(%arg0: i32) -> (i32, i32) {
    %c0_i32 = arith.constant 0 : i32
    %c0_i32_0 = arith.constant 0 : i32
    %c0_i32_1 = arith.constant 0 : i32
    return %c0_i32, %c0_i32_0 : i32, i32
  }
  func.func @transform_4(%arg0: i32) -> (i32, i32) {
    %c0_i32 = arith.constant 0 : i32
    %c0_i32_0 = arith.constant 0 : i32
    %c0_i32_1 = arith.constant 0 : i32
    return %c0_i32, %c0_i32_0 : i32, i32
  }
  func.func @transform_5(%arg0: i32) -> (i32, i32, i32) {
    %c0_i32 = arith.constant 0 : i32
    %c0_i32_0 = arith.constant 0 : i32
    %c0_i32_1 = arith.constant 0 : i32
    return %arg0, %c0_i32, %c0_i32_0 : i32, i32, i32
  }
}

module attributes {stable_mosaic.version = 11 : i64} {
  func.func @_head_attention_kernel(%arg0: i32, %arg1: memref<1x8x128xbf16, #tpu.memory_space<vmem>>, %arg2: memref<1x8x128xbf16, #tpu.memory_space<vmem>>, %arg3: memref<1x8x128xbf16, #tpu.memory_space<vmem>>, %arg4: memref<128x384xbf16, #tpu.memory_space<vmem>>, %arg5: memref<1x384xf32, #tpu.memory_space<vmem>>, %arg6: memref<1x8x128xf32, #tpu.memory_space<vmem>>) attributes {dimension_semantics = [#tpu.dimension_semantics<parallel>], iteration_bounds = array<i64: 2>, scalar_prefetch = 0 : i64, scratch_operands = 0 : i64, tpu.core_type = #tpu.core_type<tc>, window_params = [{transform_indices = @transform_0, window_bounds = array<i64: 1, 8, 128>}, {transform_indices = @transform_1, window_bounds = array<i64: 1, 8, 128>}, {transform_indices = @transform_2, window_bounds = array<i64: 1, 8, 128>}, {pipeline_mode = #tpu.pipeline_mode<synchronous>, transform_indices = @transform_3, window_bounds = array<i64: 128, 384>}, {pipeline_mode = #tpu.pipeline_mode<synchronous>, transform_indices = @transform_4, window_bounds = array<i64: 1, 384>}, {transform_indices = @transform_5, window_bounds = array<i64: 1, 8, 128>}]} {
    %c0 = arith.constant 0 : index
    %c0_0 = arith.constant 0 : index
    %0 = vector.load %arg4[%c0, %c0_0] : memref<128x384xbf16, #tpu.memory_space<vmem>>, vector<128x384xbf16>
    %c0_1 = arith.constant 0 : index
    %c0_2 = arith.constant 0 : index
    %1 = vector.load %arg5[%c0_1, %c0_2] : memref<1x384xf32, #tpu.memory_space<vmem>>, vector<1x384xf32>
    %c0_3 = arith.constant 0 : index
    %c0_4 = arith.constant 0 : index
    %c0_5 = arith.constant 0 : index
    %2 = vector.load %arg1[%c0_3, %c0_4, %c0_5] : memref<1x8x128xbf16, #tpu.memory_space<vmem>>, vector<1x8x128xbf16>
    %3 = vector.extract_strided_slice %0 {offsets = [0, 0], sizes = [128, 128], strides = [1, 1]} : vector<128x384xbf16> to vector<128x128xbf16>
    %4 = vector.extract_strided_slice %1 {offsets = [0, 0], sizes = [1, 128], strides = [1, 1]} : vector<1x384xf32> to vector<1x128xf32>
    %5 = vector.shape_cast %2 : vector<1x8x128xbf16> to vector<8x128xbf16>
    %cst = arith.constant dense<0.000000e+00> : vector<8x128xf32>
    %6 = tpu.matmul %5, %3, %cst {dimension_numbers = #tpu.dot_dimension_numbers<[1], [0], [0], [1], [0, 0, 1, 1], [], []>} : vector<8x128xbf16>, vector<128x128xbf16>, vector<8x128xf32> -> vector<8x128xf32>
    %7 = vector.shape_cast %6 : vector<8x128xf32> to vector<1x8x128xf32>
    %8 = vector.shape_cast %4 : vector<1x128xf32> to vector<1x1x128xf32>
    %9 = vector.broadcast %8 : vector<1x1x128xf32> to vector<1x8x128xf32>
    %10 = arith.addf %7, %9 : vector<1x8x128xf32>
    %c0_6 = arith.constant 0 : index
    %c0_7 = arith.constant 0 : index
    %c0_8 = arith.constant 0 : index
    %11 = vector.load %arg2[%c0_6, %c0_7, %c0_8] : memref<1x8x128xbf16, #tpu.memory_space<vmem>>, vector<1x8x128xbf16>
    %12 = vector.extract_strided_slice %0 {offsets = [0, 128], sizes = [128, 128], strides = [1, 1]} : vector<128x384xbf16> to vector<128x128xbf16>
    %13 = vector.extract_strided_slice %1 {offsets = [0, 128], sizes = [1, 128], strides = [1, 1]} : vector<1x384xf32> to vector<1x128xf32>
    %14 = vector.shape_cast %11 : vector<1x8x128xbf16> to vector<8x128xbf16>
    %cst_9 = arith.constant dense<0.000000e+00> : vector<8x128xf32>
    %15 = tpu.matmul %14, %12, %cst_9 {dimension_numbers = #tpu.dot_dimension_numbers<[1], [0], [0], [1], [0, 0, 1, 1], [], []>} : vector<8x128xbf16>, vector<128x128xbf16>, vector<8x128xf32> -> vector<8x128xf32>
    %16 = vector.shape_cast %15 : vector<8x128xf32> to vector<1x8x128xf32>
    %17 = vector.shape_cast %13 : vector<1x128xf32> to vector<1x1x128xf32>
    %18 = vector.broadcast %17 : vector<1x1x128xf32> to vector<1x8x128xf32>
    %19 = arith.addf %16, %18 : vector<1x8x128xf32>
    %c0_10 = arith.constant 0 : index
    %c0_11 = arith.constant 0 : index
    %c0_12 = arith.constant 0 : index
    %20 = vector.load %arg3[%c0_10, %c0_11, %c0_12] : memref<1x8x128xbf16, #tpu.memory_space<vmem>>, vector<1x8x128xbf16>
    %21 = vector.extract_strided_slice %0 {offsets = [0, 256], sizes = [128, 128], strides = [1, 1]} : vector<128x384xbf16> to vector<128x128xbf16>
    %22 = vector.extract_strided_slice %1 {offsets = [0, 256], sizes = [1, 128], strides = [1, 1]} : vector<1x384xf32> to vector<1x128xf32>
    %23 = vector.shape_cast %20 : vector<1x8x128xbf16> to vector<8x128xbf16>
    %cst_13 = arith.constant dense<0.000000e+00> : vector<8x128xf32>
    %24 = tpu.matmul %23, %21, %cst_13 {dimension_numbers = #tpu.dot_dimension_numbers<[1], [0], [0], [1], [0, 0, 1, 1], [], []>} : vector<8x128xbf16>, vector<128x128xbf16>, vector<8x128xf32> -> vector<8x128xf32>
    %25 = vector.shape_cast %24 : vector<8x128xf32> to vector<1x8x128xf32>
    %26 = vector.shape_cast %22 : vector<1x128xf32> to vector<1x1x128xf32>
    %27 = vector.broadcast %26 : vector<1x1x128xf32> to vector<1x8x128xf32>
    %28 = arith.addf %25, %27 : vector<1x8x128xf32>
    %29 = arith.truncf %10 : vector<1x8x128xf32> to vector<1x8x128xbf16>
    %30 = arith.truncf %19 : vector<1x8x128xf32> to vector<1x8x128xbf16>
    %31 = arith.truncf %28 : vector<1x8x128xf32> to vector<1x8x128xbf16>
    "tpu.trace_start"() <{level = 10 : i32, message = "bqd,bkd->bqk"}> : () -> ()
    %cst_14 = arith.constant dense<0.000000e+00> : vector<1x8x8xf32>
    %32 = tpu.matmul %29, %30, %cst_14 {dimension_numbers = #tpu.dot_dimension_numbers<[2], [2], [1], [1], [0, 0, 0, 1, 1, 1], [0], [0]>} : vector<1x8x128xbf16>, vector<1x8x128xbf16>, vector<1x8x8xf32> -> vector<1x8x8xf32>
    "tpu.trace_stop"() : () -> ()
    %cst_15 = arith.constant dense<0xFF800000> : vector<1x8xf32>
    %33 = vector.multi_reduction <maximumf>, %32, %cst_15 [2] : vector<1x8x8xf32> to vector<1x8xf32>
    %34 = vector.shape_cast %33 : vector<1x8xf32> to vector<1x8x1xf32>
    %35 = vector.broadcast %34 : vector<1x8x1xf32> to vector<1x8x8xf32>
    %36 = arith.subf %32, %35 : vector<1x8x8xf32>
    %37 = math.exp %36 : vector<1x8x8xf32>
    %cst_16 = arith.constant dense<0.000000e+00> : vector<1x8xf32>
    %38 = vector.multi_reduction <add>, %37, %cst_16 [2] : vector<1x8x8xf32> to vector<1x8xf32>
    %39 = vector.shape_cast %38 : vector<1x8xf32> to vector<1x8x1xf32>
    %40 = arith.truncf %37 : vector<1x8x8xf32> to vector<1x8x8xbf16>
    "tpu.trace_start"() <{level = 10 : i32, message = "bqk,bkd->bqd"}> : () -> ()
    %cst_17 = arith.constant dense<0.000000e+00> : vector<1x8x128xf32>
    %41 = tpu.matmul %40, %31, %cst_17 {dimension_numbers = #tpu.dot_dimension_numbers<[2], [1], [1], [2], [0, 0, 0, 1, 1, 2], [0], [0]>} : vector<1x8x8xbf16>, vector<1x8x128xbf16>, vector<1x8x128xf32> -> vector<1x8x128xf32>
    "tpu.trace_stop"() : () -> ()
    %42 = tpu.reciprocal %39 {approx = true} : vector<1x8x1xf32> -> vector<1x8x1xf32>
    %43 = vector.broadcast %42 : vector<1x8x1xf32> to vector<1x8x128xf32>
    %44 = arith.mulf %41, %43 : vector<1x8x128xf32>
    %c0_18 = arith.constant 0 : index
    %c0_19 = arith.constant 0 : index
    %c0_20 = arith.constant 0 : index
    %45 = vector.load %arg6[%c0_18, %c0_19, %c0_20] : memref<1x8x128xf32, #tpu.memory_space<vmem>>, vector<1x8x128xf32>
    tpu.vector_store %arg6[%c0_18, %c0_19, %c0_20], %44 {strides = array<i32>} : memref<1x8x128xf32, #tpu.memory_space<vmem>>, vector<1x8x128xf32>,
    return
  }
  func.func @transform_0(%arg0: i32) -> (i32, i32, i32) {
    %c0_i32 = arith.constant 0 : i32
    %c0_i32_0 = arith.constant 0 : i32
    %c0_i32_1 = arith.constant 0 : i32
    return %arg0, %c0_i32, %c0_i32_0 : i32, i32, i32
  }
  func.func @transform_1(%arg0: i32) -> (i32, i32, i32) {
    %c0_i32 = arith.constant 0 : i32
    %c0_i32_0 = arith.constant 0 : i32
    %c0_i32_1 = arith.constant 0 : i32
    return %arg0, %c0_i32, %c0_i32_0 : i32, i32, i32
  }
  func.func @transform_2(%arg0: i32) -> (i32, i32, i32) {
    %c0_i32 = arith.constant 0 : i32
    %c0_i32_0 = arith.constant 0 : i32
    %c0_i32_1 = arith.constant 0 : i32
    return %arg0, %c0_i32, %c0_i32_0 : i32, i32, i32
  }
  func.func @transform_3(%arg0: i32) -> (i32, i32) {
    %c0_i32 = arith.constant 0 : i32
    %c0_i32_0 = arith.constant 0 : i32
    %c0_i32_1 = arith.constant 0 : i32
    return %c0_i32, %c0_i32_0 : i32, i32
  }
  func.func @transform_4(%arg0: i32) -> (i32, i32) {
    %c0_i32 = arith.constant 0 : i32
    %c0_i32_0 = arith.constant 0 : i32
    %c0_i32_1 = arith.constant 0 : i32
    return %c0_i32, %c0_i32_0 : i32, i32
  }
  func.func @transform_5(%arg0: i32) -> (i32, i32, i32) {
    %c0_i32 = arith.constant 0 : i32
    %c0_i32_0 = arith.constant 0 : i32
    %c0_i32_1 = arith.constant 0 : i32
    return %arg0, %c0_i32, %c0_i32_0 : i32, i32, i32
  }
}

</mosaic_0001>

<bundles_post_ra>
// kernel: tpu_custom_call.1
= control target key start
LH: loop header
LB: loop body
LE: loop exit
PB: predicated region body
PF: predicated region fallthrough
CT: control target
= control target key end

     0   :  { %s1397_s0 = inlined_call_operand.hbm [shape: bf16[2,8,128], index: 0, kind: input, shape index: {}]   ;;  %s1398_s1 = inlined_call_operand.hbm [shape: bf16[2,8,128], index: 1, kind: input, shape index: {}]   ;;  %s1399_s2 = inlined_call_operand.hbm [shape: bf16[2,8,128], index: 2, kind: input, shape index: {}]   ;;  %s1400_s3 = inlined_call_operand.hbm [shape: bf16[128,384], index: 3, kind: input, shape index: {}]   ;;  %s1401_s4 = inlined_call_operand.vmem [shape: f32[1,384], index: 4, kind: input, shape index: {}]   ;;  %s1402_s5 = inlined_call_operand.hbm [shape: f32[2,8,128], index: 5, kind: output, shape index: {}]  }
   0x1   :  { %1407 = sst [smem:[#allocation18_spill]] %s1398_s1 }
   0x2   :  { %1408 = sst [smem:[#allocation19_spill]] %s1400_s3 }
   0x3   :  { %10 = vsyncpa [#allocation3], 0 }
   0x4   :  { %12 = vsyncpa [#allocation3 + $0x1], 0 }
   0x5   :  { %13 = vsyncpa [#allocation6], 0 }
   0x6   :  { %15 = vsyncpa [#allocation6 + $0x1], 0 }
   0x7   :  { %16 = vsyncpa [#allocation9], 0 }
   0x8   :  { %17 = vsyncpa [#allocation4], 0 }
   0x9   :  { %19 = vsyncpa [#allocation4 + $0x1], 0  ;;  %s1182_s18 = smov 0   ;;  %s1184_s19 = smov 0  }
   0xa   :  { %s1186_s20 = smov 0   ;;  %s1188_s21 = smov 0  }
   0xb LB: > { %1409 = sst [smem:[#allocation15_spill]] %s1147_s21  ;;  %s1203_s22 = sadd.s32 4294967295, %s1147_s21   ;;  %s1147_s21 = sphi %s1188_s21, %s1422_s21   ;;  %s1143_s20 = sphi %s1186_s20, %s1426_s20   ;;  %s1139_s19 = sphi %s1184_s19, %s1425_s19   ;;  %s1135_s18 = sphi %s1182_s18, %s1424_s18  }
   0xc   : > { %s739_s23 = sadd.s32 4294967294, %s1147_s21   ;;  %s1207_s24 = sadd.s32 1, %s1147_s21  }
   0xd   : > { %1410 = sst [smem:[#allocation16_spill]] %s1207_s24  ;;  %s32_s25 = sadd.s32 1, %s1143_s20 }
   0xe   : > { %s29_s26 = ssub.s32 %s1147_s21, %s1207_s24  ;;  %p39_p0 = scmp.ne.s32.totalorder %s1143_s20, %s1139_s19 }
   0xf   : > { %p30_p1 = scmp.eq.s32.totalorder %s29_s26, 0  ;;  %p40_p2 = scmp.eq.s32.totalorder %s1147_s21, 0 }
  0x10   : > { %p45_p3 = scmp.ne.s32.totalorder %s1139_s19, %s1135_s18  ;;  %p163_p4 = scmp.eq.s32.totalorder %s1203_s22, 1 }
  0x11   : > { %s1219_s27 = scalar_select %p30_p1, %s1143_s20, %s32_s25  }
  0x12   : > { %p41_p5 = por %p40_p2, %p39_p0  ;;  %p1221_p6 = por %p163_p4, %p39_p0 }
  0x13   : > { %1411 = sst [smem:[#allocation17_spill]] %s1219_s27  ;;  %p169_p7 = scmp.eq.s32.totalorder %s739_s23, 1 }
  0x14   : > { %p911_p9 = scmp.lt.s32.totalorder %s1147_s21, 2  ;;  %s1403_s30 = sand.u32 1, %s1143_s20  }
  0x15   : > { %p1230_p10 = por %p169_p7, %p45_p3  ;;  %s1237_s6 = sshll.u32 %s1403_s30, 2 }
  0x16   : > { %s1240_s7 = sshll.u32 %s1147_s21, 2  ;;  %p1242_p11 = pnand %p911_p9, %p41_p5 }
  0x17   : > { %s225_s9 = sand.u32 1, %s1147_s21   ;;  %s1415_s1 = sld [smem:[#allocation18_spill]] }
  0x18   : > { %s229_s14 = scalar_lea.vmem [#allocation5], %s1237_s6  ;;  %s1252_s16 = scalar_lea.sflag [#allocation6], %s225_s9 }
  0x19   : > { %s237_s15 = sshll.u32 %s229_s14, 4  ;;  %p957_p13 = pneg %p1242_p11  ;;  %s238_s15 = int_to_ptr.vmem [resolvable:$true] %s237_s15 }
  0x1d   : > { %s233_s12 = scalar_lea.hbm %s1415_s1, %s1240_s7  ;;  %s960_s10 = scalar_lea.hbm %s1415_s1, 8 }
  0x1e   : > { %s235_s13 = sshll.u32 %s233_s12, 4  ;;  %s236_s13 = int_to_ptr.hbm [resolvable:$true] %s235_s13 }
  0x1f   : > { %s953_s17 = sshra.s32 %s236_s13, 4  ;;  %s954_s17 = int_to_ptr.hbm [resolvable:$true] %s953_s17 }
  0x20   : > { %s955_s23 = scalar_lea.hbm %s954_s17, 4  ;;  %p961_p2 = scmp.lt.s32.totalorder %s954_s17, %s1415_s1 }
  0x21   : > { %p956_p12 = scmp.ne.s32.totalorder %s954_s17, %s955_s23  ;;  %p962_p4 = scmp.lt.s32.totalorder %s960_s10, %s955_s23 }
  0x23   : > { %p958_p0 = pnand %p957_p13, %p956_p12  ;;  %p963_p5 = por %p962_p4, %p961_p2 }
  0x25   : > { %p959_p1 = pneg %p958_p0 }
  0x27   : > { %p964_p7 = pnand %p963_p5, %p959_p1 }
  0x29   : > { %967 = shalt.err (!%p964_p7)
}
  0x2a   : > { %902 = dma.hbm_to_vmem [thread:$0]  (!%p1242_p11), %s236_s13, 64, %s238_s15, %s1252_s16  }
  0x2b   : > { %p46_p9 = scmp.eq.s32.totalorder %s1203_s22, 0  ;;  %p740_p12 = scmp.ge.s32.totalorder %s1147_s21, 1 }
  0x2c   : > { %p176_p0 = scmp.lt.s32.totalorder %s1147_s21, 3  ;;  %s1416_s3 = sld [smem:[#allocation19_spill]] }
  0x2d   : > { %p1279_p1 = por %p46_p9, %p45_p3  ;;  %s1149_s13 = smov [#allocation8]  }
  0x2e   : > { %p1283_p2 = pnand %p740_p12, %p176_p0  ;;  %s189_s15 = sshll.u32 %s1149_s13, 4  ;;  %s190_s15 = int_to_ptr.vmem [resolvable:$true] %s189_s15 }
  0x2f   : > { %s214_s11 = scalar_lea.hbm %s1397_s0, %s1240_s7  ;;  %s210_s12 = scalar_lea.vmem [#allocation2], %s1237_s6 }
  0x30   : > { %p892_p4 = pneg %p1283_p2  ;;  %s218_s9 = sshll.u32 %s210_s12, 4  ;;  %s219_s9 = int_to_ptr.vmem [resolvable:$true] %s218_s9 }
  0x31   : > { %s216_s14 = sshll.u32 %s214_s11, 4  ;;  %s1150_s30 = smov 192   ;;  %s217_s14 = int_to_ptr.hbm [resolvable:$true] %s216_s14 }
  0x32   : > { %s187_s17 = sshll.u32 %s1416_s3, 4  ;;  %p893_p5 = pnand %p892_p4, %p46_p9  ;;  %s188_s17 = int_to_ptr.hbm [resolvable:$true] %s187_s17 }
  0x33   : > { %s1151_s1 = smov 12   ;;  %s1419_s3 = sand.u32 1, %s1143_s20  }
  0x34   : > { %895 = dma.hbm_to_vmem [thread:$0]  (!%p893_p5), %s188_s17, 3072, %s190_s15, [#allocation9], %s1150_s30, %s1150_s30, %s1151_s1  }
  0x35   : > { %s207_s13 = scalar_lea.sflag [#allocation3], %s1419_s3  ;;  %s1013_s27 = sshra.s32 %s217_s14, 4  ;;  %s1014_s27 = int_to_ptr.hbm [resolvable:$true] %s1013_s27 }
  0x36   : > { %s1015_s24 = scalar_lea.hbm %s1014_s27, 4  ;;  %s1020_s12 = scalar_lea.hbm %s1397_s0, 8 }
  0x37   : > { %p1016_p3 = scmp.ne.s32.totalorder %s1014_s27, %s1015_s24  ;;  %p1021_p0 = scmp.lt.s32.totalorder %s1014_s27, %s1397_s0 }
  0x38   : > { %p1022_p4 = scmp.lt.s32.totalorder %s1020_s12, %s1015_s24 }
  0x39   : > { %p1018_p7 = pnand %p1016_p3, %p957_p13 }
  0x3a   : > { %p1023_p5 = por %p1022_p4, %p1021_p0 }
  0x3b   : > { %p1019_p12 = pneg %p1018_p7 }
  0x3d   : > { %p1024_p8 = pnand %p1023_p5, %p1019_p12 }
  0x3f   : > { %1027 = shalt.err (!%p1024_p8)
}
  0x40   : > { %899 = dma.hbm_to_vmem [thread:$0]  (!%p1242_p11), %s217_s14, 64, %s219_s9, %s207_s13  }
  0x41   : > { %s252_s30 = scalar_lea.hbm %s1399_s2, %s1240_s7  ;;  %s248_s15 = scalar_lea.vmem [#allocation7], %s1237_s6 }
  0x42   : > { %s254_s17 = sshll.u32 %s252_s30, 4  ;;  %s256_s26 = sshll.u32 %s248_s15, 4  ;;  %s255_s17 = int_to_ptr.hbm [resolvable:$true] %s254_s17  ;;  %s257_s26 = int_to_ptr.vmem [resolvable:$true] %s256_s26 }
  0x43   : > { %s1043_s21 = sshra.s32 %s255_s17, 4  ;;  %s1050_s9 = scalar_lea.hbm %s1399_s2, 8  ;;  %s1044_s21 = int_to_ptr.hbm [resolvable:$true] %s1043_s21 }
  0x44   : > { %s1045_s24 = scalar_lea.hbm %s1044_s21, 4  ;;  %p1051_p12 = scmp.lt.s32.totalorder %s1044_s21, %s1399_s2 }
  0x45   : > { %p1046_p3 = scmp.ne.s32.totalorder %s1044_s21, %s1045_s24  ;;  %p1052_p0 = scmp.lt.s32.totalorder %s1050_s9, %s1045_s24 }
  0x47   : > { %p1048_p8 = pnand %p1046_p3, %p957_p13  ;;  %p1053_p4 = por %p1052_p0, %p1051_p12 }
  0x49   : > { %p1049_p7 = pneg %p1048_p8 }
  0x4b   : > { %p1054_p5 = pnand %p1053_p4, %p1049_p7 }
  0x4d   : > { %1057 = shalt.err (!%p1054_p5)
}
  0x4e   : > { %905 = dma.hbm_to_vmem [thread:$0]  (!%p1242_p11), %s255_s17, 64, %s257_s26, %s1252_s16  }
  0x4f   : > { %265 = sbr.rel (%p1283_p2) target bundleno = 664 (0x298), region = 40  ;;  %s1329_s6 = sand.u32 (!%p1283_p2), 1, %s1139_s19  }
  0x50   : > { %s1332_s7 = sshll.u32 (!%p1283_p2), %s1329_s6, 2  ;;  %s268_s12 = scalar_lea.sflag (!%p1283_p2), [#allocation3], %s1329_s6 }
  0x51   : > { %s271_s11 = scalar_lea.vmem (!%p1283_p2), [#allocation2], %s1332_s7 }
  0x54   : > { %1118 = dma.done.wait (%p1279_p1), %s268_s12, 64  }
  0x55   : > { %1120 = vsyncadd (%p1279_p1), %s268_s12, 4294967232  ;;  %s277_s8 = sand.u32 1, %s1203_s22   ;;  %s281_s25 = scalar_lea.vmem [#allocation5], %s1332_s7 }
  0x56   : > { %s278_s16 = scalar_lea.sflag [#allocation6], %s277_s8 }
  0x57   : > { %1122 = dma.done.wait (%p1279_p1), %s278_s16, 128  }
  0x58   : > { %1124 = vsyncadd (%p1279_p1), %s278_s16, 4294967168  ;;  %s291_s1 = scalar_lea.vmem [#allocation7], %s1332_s7 }
  0x59   : > { %1126 = dma.done.wait (%p46_p9), [#allocation9], 3072  }
  0x5a   : > { %1128 = vsyncadd (%p46_p9), [#allocation9], 4294964224  ;;  %v785_v0 = vld [vmem:[#allocation8 + $0xa8] sm:$0xf]  ;;  %v878_v1 = vld [vmem:[#allocation8 + $0xb0] sm:$0xf0] }
  0x5b   : > { %v877_v2 = vld [vmem:[#allocation8 + $0xac] sm:$0xf]  ;;  %v786_v3 = vor.u32 %v878_v1, %v785_v0  ;;  %v815_v4 = vld [vmem:[#allocation8 + $0xb4] sm:$0xf0]  ;;  %v781_v5 = vld [vmem:[#allocation8 + $0x90] sm:$0xf] }
  0x5c   : > { %v875_v6 = vld [vmem:[#allocation8 + $0x98] sm:$0xf0]  ;;  %v818_v7 = vor.u32 %v877_v2, %v815_v4  ;;  %v874_v8 = vld [vmem:[#allocation8 + $0x94] sm:$0xf]  ;;  %v811_v9 = vld [vmem:[#allocation8 + $0x9c] sm:$0xf0] }
  0x5d   : > { %417 = vmatpush.bf16.msra.mxu0 %v786_v3  ;;  %v782_v10 = vor.u32 %v875_v6, %v781_v5  ;;  %v814_v11 = vor.u32 %v874_v8, %v811_v9  ;;  %v777_v12 = vld [vmem:[#allocation8 + $0x78] sm:$0xf]  ;;  %v872_v13 = vld [vmem:[#allocation8 + $0x80] sm:$0xf0]  ;;  %v871_v14 = vld [vmem:[#allocation8 + $0x7c] sm:$0xf] }
  0x5e   : > { %467 = vmatpush.bf16.msra.mxu1 %v818_v7  ;;  %v807_v15 = vld [vmem:[#allocation8 + $0x84] sm:$0xf0]  ;;  %v778_v16 = vor.u32 %v872_v13, %v777_v12  ;;  %v773_v18 = vld [vmem:[#allocation8 + $0x60] sm:$0xf]  ;;  %v869_v19 = vld [vmem:[#allocation8 + $0x68] sm:$0xf0] }
  0x5f   : > { %v810_v17 = vor.u32 %v871_v14, %v807_v15  ;;  %v868_v20 = vld [vmem:[#allocation8 + $0x64] sm:$0xf]  ;;  %v803_v21 = vld [vmem:[#allocation8 + $0x6c] sm:$0xf0]  ;;  %v774_v22 = vor.u32 %v869_v19, %v773_v18  ;;  %v769_v24 = vld [vmem:[#allocation8 + $0x48] sm:$0xf] }
  0x60   : > { %v806_v23 = vor.u32 %v868_v20, %v803_v21  ;;  %v866_v25 = vld [vmem:[#allocation8 + $0x50] sm:$0xf0]  ;;  %v865_v26 = vld [vmem:[#allocation8 + $0x4c] sm:$0xf]  ;;  %v799_v27 = vld [vmem:[#allocation8 + $0x54] sm:$0xf0] }
  0x61   : > { %418 = vmatpush.bf16.msra.mxu0 %v782_v10  ;;  %v770_v28 = vor.u32 %v866_v25, %v769_v24  ;;  %v802_v29 = vor.u32 %v865_v26, %v799_v27  ;;  %v765_v30 = vld [vmem:[#allocation8 + $0x30] sm:$0xf]  ;;  %v863_v31 = vld [vmem:[#allocation8 + $0x38] sm:$0xf0]  ;;  %v862_v32 = vld [vmem:[#allocation8 + $0x34] sm:$0xf] }
  0x62   : > { %468 = vmatpush.bf16.msra.mxu1 %v814_v11  ;;  %v795_v33 = vld [vmem:[#allocation8 + $0x3c] sm:$0xf0]  ;;  %v766_v34 = vor.u32 %v863_v31, %v765_v30  ;;  %v761_v36 = vld [vmem:[#allocation8 + $0x18] sm:$0xf]  ;;  %v860_v37 = vld [vmem:[#allocation8 + $0x20] sm:$0xf0] }
  0x63   : > { %v798_v35 = vor.u32 %v862_v32, %v795_v33  ;;  %v859_v38 = vld [vmem:[#allocation8 + $0x1c] sm:$0xf]  ;;  %v791_v39 = vld [vmem:[#allocation8 + $0x24] sm:$0xf0]  ;;  %v762_v40 = vor.u32 %v860_v37, %v761_v36  ;;  %v757_v42 = vld [vmem:[#allocation8] sm:$0xf] }
  0x64   : > { %v794_v41 = vor.u32 %v859_v38, %v791_v39  ;;  %v857_v43 = vld [vmem:[#allocation8 + $0x8] sm:$0xf0]  ;;  %v856_v44 = vld [vmem:[#allocation8 + $0x4] sm:$0xf]  ;;  %v787_v45 = vld [vmem:[#allocation8 + $0xc] sm:$0xf0] }
  0x65   : > { %419 = vmatpush.bf16.msra.mxu0 %v778_v16  ;;  %v758_v46 = vor.u32 %v857_v43, %v757_v42  ;;  %v790_v47 = vor.u32 %v856_v44, %v787_v45  ;;  %v368_v48 = vld [vmem:[%s271_s11] sm:$0xf]  ;;  %v434_v49 = vld [vmem:[%s281_s25] sm:$0xf]  ;;  %v879_v51 = vld [vmem:[#allocation8 + $0xb8] sm:$0xf0] }
  0x66   : > { %469 = vmatpush.bf16.msra.mxu1 %v810_v17  ;;  %v849_v50 = vld [vmem:[#allocation8 + $0xb0] sm:$0xf]  ;;  %v845_v52 = vld [vmem:[#allocation8 + $0x98] sm:$0xf]  ;;  %v876_v54 = vld [vmem:[#allocation8 + $0xa0] sm:$0xf0] }
  0x67   : > { %v850_v53 = vor.u32 %v879_v51, %v849_v50  ;;  %v846_v55 = vor.u32 %v876_v54, %v845_v52  ;;  %v841_v56 = vld [vmem:[#allocation8 + $0x80] sm:$0xf]  ;;  %v873_v57 = vld [vmem:[#allocation8 + $0x88] sm:$0xf0]  ;;  %v837_v59 = vld [vmem:[#allocation8 + $0x68] sm:$0xf] }
  0x68   : > { %v842_v58 = vor.u32 %v873_v57, %v841_v56  ;;  %v870_v60 = vld [vmem:[#allocation8 + $0x70] sm:$0xf0]  ;;  %v367_v61 = vld [vmem:[%s1401_s4] sm:$0x7]  ;;  %v833_v63 = vld [vmem:[#allocation8 + $0x50] sm:$0xf] }
  0x69   : > { %420 = vmatpush.bf16.msra.mxu0 %v774_v22  ;;  %533 = vmatpush.bf16.msra.mxu2 %v850_v53  ;;  %v838_v62 = vor.u32 %v870_v60, %v837_v59  ;;  %v867_v0 = vld [vmem:[#allocation8 + $0x58] sm:$0xf0]  ;;  %v480_v1 = vrot.slane %v367_v61, 1  ;;  %v829_v3 = vld [vmem:[#allocation8 + $0x38] sm:$0xf]  ;;  %v431_v8 = vperm.slane %v367_v61, 0 }
  0x6a   : > { %470 = vmatpush.bf16.msra.mxu1 %v806_v23  ;;  %v834_v2 = vor.u32 %v867_v0, %v833_v63  ;;  %v864_v4 = vld [vmem:[#allocation8 + $0x40] sm:$0xf0]  ;;  %v825_v10 = vld [vmem:[#allocation8 + $0x20] sm:$0xf]  ;;  %v861_v11 = vld [vmem:[#allocation8 + $0x28] sm:$0xf0] }
  0x6b   : > { %v481_v5 = vperm.slane %v480_v1, 0  ;;  %v830_v7 = vor.u32 %v864_v4, %v829_v3  ;;  %v826_v14 = vor.u32 %v861_v11, %v825_v10  ;;  %v821_v16 = vld [vmem:[#allocation8 + $0x8] sm:$0xf]  ;;  %v858_v17 = vld [vmem:[#allocation8 + $0x10] sm:$0xf0]  ;;  %v546_v23 = vrot.slane %v367_v61, 2 }
  0x6c   : > { %v822_v19 = vor.u32 %v858_v17, %v821_v16  ;;  %v484_v22 = vld [vmem:[%s291_s1] sm:$0xf]  ;;  %vm566_vm0 = vcmask 64512   ;;  %vm580_vm1 = vcmask 1043456   ;;  %s853_s30 = sshll.u32 %s1203_s22, 3  ;;  %s754_s17 = sshll.u32 %s1329_s6, 3 }
  0x6d   : > { %421 = vmatpush.bf16.msra.mxu0 %v770_v28  ;;  %534 = vmatpush.bf16.msra.mxu2 %v846_v55  ;;  %v547_v24 = vperm.slane %v546_v23, 0  ;;  %s611_s21 = scalar_lea.hbm %s1402_s5, %s853_s30  ;;  %s333_s24 = scalar_lea.vmem [#allocation10], %s754_s17 }
  0x6e   : > { %471 = vmatpush.bf16.msra.mxu1 %v802_v29  ;;  %s613_s27 = sshll.u32 %s333_s24, 4  ;;  %s615_s10 = sshll.u32 %s611_s21, 4  ;;  %s614_s27 = int_to_ptr.vmem [resolvable:$true] %s613_s27  ;;  %s616_s10 = int_to_ptr.hbm [resolvable:$true] %s615_s10 }
  0x6f   : > { %s601_s9 = scalar_lea.sflag [#allocation4], %s1329_s6  ;;  %s1087_s14 = sshra.s32 %s616_s10, 4  ;;  %s1088_s14 = int_to_ptr.hbm [resolvable:$true] %s1087_s14 }
  0x70   : > { %s1089_s22 = scalar_lea.hbm %s1088_s14, 8  ;;  %s1093_s12 = scalar_lea.hbm %s1402_s5, 16 }
  0x71   : > { %422 = vmatpush.bf16.msra.mxu0 %v766_v34  ;;  %535 = vmatpush.bf16.msra.mxu2 %v842_v58  ;;  %p1090_p11 = scmp.ne.s32.totalorder %s1088_s14, %s1089_s22  ;;  %p1094_p1 = scmp.lt.s32.totalorder %s1088_s14, %s1402_s5 }
  0x72   : > { %472 = vmatpush.bf16.msra.mxu1 %v798_v35  ;;  %p1095_p2 = scmp.lt.s32.totalorder %s1093_s12, %s1089_s22 }
  0x73   : > { %p1091_p13 = pnand %p1090_p11, %p1221_p6 }
  0x74   : > { %p1096_p3 = por %p1095_p2, %p1094_p1 }
  0x75   : > { %423 = vmatpush.bf16.msra.mxu0 %v762_v40  ;;  %536 = vmatpush.bf16.msra.mxu2 %v838_v62  ;;  %p1092_p9 = pneg %p1091_p13 }
  0x76   : > { %473 = vmatpush.bf16.msra.mxu1 %v794_v41 }
  0x77   : > { %p1097_p8 = pnand %p1096_p3, %p1092_p9 }
  0x79   : > { %424 = vmatpush.bf16.msra.mxu0 %v758_v46  ;;  %537 = vmatpush.bf16.msra.mxu2 %v834_v2 }
  0x7a   : > { %474 = vmatpush.bf16.msra.mxu1 %v790_v47 }
  0x7c   : > { %425 = vmatmul.bf16.vlgmr.msra.gmra.mxu0 %v368_v48 }
  0x7d   : > { %475 = vmatmul.bf16.vlgmr.msra.gmra.mxu1 %v434_v49  ;;  %538 = vmatpush.bf16.msra.mxu2 %v830_v7 }
  0x81   : > { %539 = vmatpush.bf16.msra.mxu2 %v826_v14 }
  0x85   : > { %540 = vmatpush.bf16.msra.mxu2 %v822_v19 }
  0x88   : > { %541 = vmatmul.bf16.vlgmr.msra.gmra.mxu2 %v484_v22 }
  0xf9   : > { %v426_v6 = vpop.f32.mrf.mxu0 }
  0xfa   : > { %v476_v9 = vpop.f32.mrf.mxu1  ;;  %v433_v15 = vadd.f32 %v431_v8, %v426_v6 }
  0xfb   : > { %v483_v12 = vadd.f32 %v481_v5, %v476_v9 }
  0xfc   : > { %v550_v20 = vpack.c.bf16 %v433_v15, %v433_v15 }
  0xfd   : > { %v551_v13 = vpack.c.bf16 %v483_v12, %v483_v12 }
  0xff   : > { %560 = vmatpush.bf16.xpose.msra.mxu3 %v551_v13 }
 0x101   : > { %v428_v18 = vpop.f32.mrf.mxu0 }
 0x102   : > { %v478_v21 = vpop.f32.mrf.mxu1 }
 0x106   : > { %561 = vmatmul.bf16.vlgmr.msra.gmra.mxu3 %v550_v20 }
 0x10b   : > { %v542_v27 = vpop.f32.mrf.mxu2 }
 0x10c   : > { %v549_v28 = vadd.f32 %v547_v24, %v542_v27 }
 0x10e   : > { %v552_v29 = vpack.c.bf16 %v549_v28, %v549_v28 }
 0x110   : > { %v582_v30 = vsel %vm580_vm1, %v552_v29, 0 }
 0x111   : > { %591 = vmatpush.bf16.msrb.mxu3 %v582_v30 }
 0x113   : > { %v544_v32 = vpop.f32.mrf.mxu2 }
 0x189   : > { %v562_v25 = vpop.f32.mrf.mxu3 }
 0x18a   : > { %v567_v26 = vsel %vm566_vm0, %v562_v25, -inf }
 0x18b   : > { %568 = vmax.xlane.f32.xlu0 %v567_v26 }
 0x191   : > { %v564_v31 = vpop.f32.mrf.mxu3 }
 0x1fe   : > { %v569_v33 = vpop.xlane.xlu0 %568 }
 0x1ff   : > { %v570_v34 = vsub.f32 %v562_v25, %v569_v33 }
 0x201   : > { %v571_v35 = vmul.f32 1.442695, %v570_v34 }
 0x203   : > { %949 = vpow2.f32 %v571_v35 }
 0x209   : > { %v950_v36 = vpop.eup %949 }
 0x20a   : > { %v573_v37 = vsel %vm566_vm0, %v950_v36, 0.0  ;;  %v576_v38 = vpack.c.bf16 %v950_v36, %v950_v36 }
 0x20b   : > { %574 = vadd.xlane.f32.xlu0 %v573_v37 }
 0x20c   : > { %851 = vmatmul.msk.bf16.vlgmr.msrb.gmra.mxu3 %vm566_vm0, %v576_v38 }
 0x27e   : > { %v575_v39 = vpop.xlane.xlu0 %574 }
 0x27f   : > { %951 = vrcp.f32 %v575_v39 }
 0x285   : > { %v952_v40 = vpop.eup %951 }
 0x28f   : > { %v593_v41 = vpop.f32.mrf.mxu3 }
 0x290   : > { %v598_v42 = vmul.f32 %v952_v40, %v593_v41 }
 0x292   : > { %599 = vst [vmem:[%s333_s24] sm:$0xff] %v598_v42 }
 0x293   : > { %1100 = shalt.err (!%p1097_p8)
}
 0x294   : > { %890 = dma.vmem_to_hbm [thread:$0]  (%p1221_p6), %s614_s27, 128, %s616_s10, %s601_s9  }
 0x297   : > { %v595_v43 = vpop.f32.mrf.mxu3 }
 0x298 PF: > { %s1420_s6 = sld [smem:[#allocation15_spill]]  ;;  %s627_s16 = sand.u32 1, %s1135_s18  }
 0x299   : > { %s628_s25 = scalar_lea.sflag [#allocation4], %s627_s16 }
 0x29e   : > { %p1421_p7 = scmp.ge.s32.totalorder %s1420_s6, 2 }
 0x2a0   : > { %p907_p12 = pnand %p1421_p7, %p1230_p10 }
 0x2a2   : > { %p908_p0 = pneg %p907_p12 }
 0x2a4   : > { %1130 = dma.done.wait (%p908_p0), %s628_s25, 128  }
 0x2a5   : > { %1132 = vsyncadd (%p908_p0), %s628_s25, 4294967168  ;;  %s1422_s21 = sld [smem:[#allocation16_spill]]  ;;  %s1424_s18 = smov %s1139_s19 }
 0x2a6   : > { %s1423_s1 = sld [smem:[#allocation17_spill]]  ;;  %s1425_s19 = smov %s1143_s20 }
 0x2ab   : > { %p22_p4 = scmp.ge.s32.totalorder %s1422_s21, 4  }
 0x2ac   : > { %s1426_s20 = smov %s1423_s1 }
 0x2ad   :  { %24 = sbr.rel (!%p22_p4) target bundleno = 11 (0xb), region = 113 }
 0x2b2   :  { %634 = vsyncpa [#allocation3], 1 }
 0x2b3   :  { %636 = vsyncpa [#allocation3 + $0x1], 1 }
 0x2b4   :  { %637 = vsyncpa [#allocation6], 1 }
 0x2b5   :  { %639 = vsyncpa [#allocation6 + $0x1], 1 }
 0x2b6   :  { %640 = vsyncpa [#allocation9], 1 }
 0x2b7   :  { %641 = vsyncpa [#allocation4], 1 }
 0x2b8   :  { %643 = vsyncpa [#allocation4 + $0x1], 1 }

// kernel: tpu_custom_call.1
= control target key start
LH: loop header
LB: loop body
LE: loop exit
PB: predicated region body
PF: predicated region fallthrough
CT: control target
= control target key end

     0   :  { %s1397_s0 = inlined_call_operand.hbm [shape: bf16[2,8,128], index: 0, kind: input, shape index: {}]   ;;  %s1398_s1 = inlined_call_operand.hbm [shape: bf16[2,8,128], index: 1, kind: input, shape index: {}]   ;;  %s1399_s2 = inlined_call_operand.hbm [shape: bf16[2,8,128], index: 2, kind: input, shape index: {}]   ;;  %s1400_s3 = inlined_call_operand.hbm [shape: bf16[128,384], index: 3, kind: input, shape index: {}]   ;;  %s1401_s4 = inlined_call_operand.vmem [shape: f32[1,384], index: 4, kind: input, shape index: {}]   ;;  %s1402_s5 = inlined_call_operand.hbm [shape: f32[2,8,128], index: 5, kind: output, shape index: {}]  }
   0x1   :  { %1407 = sst [smem:[#allocation18_spill]] %s1398_s1 }
   0x2   :  { %1408 = sst [smem:[#allocation19_spill]] %s1400_s3 }
   0x3   :  { %10 = vsyncpa [#allocation3], 0 }
   0x4   :  { %12 = vsyncpa [#allocation3 + $0x1], 0 }
   0x5   :  { %13 = vsyncpa [#allocation6], 0 }
   0x6   :  { %15 = vsyncpa [#allocation6 + $0x1], 0 }
   0x7   :  { %16 = vsyncpa [#allocation9], 0 }
   0x8   :  { %17 = vsyncpa [#allocation4], 0 }
   0x9   :  { %19 = vsyncpa [#allocation4 + $0x1], 0  ;;  %s1182_s18 = smov 0   ;;  %s1184_s19 = smov 0  }
   0xa   :  { %s1186_s20 = smov 0   ;;  %s1188_s21 = smov 0  }
   0xb LB: > { %1409 = sst [smem:[#allocation15_spill]] %s1147_s21  ;;  %s1203_s22 = sadd.s32 4294967295, %s1147_s21   ;;  %s1147_s21 = sphi %s1188_s21, %s1422_s21   ;;  %s1143_s20 = sphi %s1186_s20, %s1426_s20   ;;  %s1139_s19 = sphi %s1184_s19, %s1425_s19   ;;  %s1135_s18 = sphi %s1182_s18, %s1424_s18  }
   0xc   : > { %s739_s23 = sadd.s32 4294967294, %s1147_s21   ;;  %s1207_s24 = sadd.s32 1, %s1147_s21  }
   0xd   : > { %1410 = sst [smem:[#allocation16_spill]] %s1207_s24  ;;  %s32_s25 = sadd.s32 1, %s1143_s20 }
   0xe   : > { %s29_s26 = ssub.s32 %s1147_s21, %s1207_s24  ;;  %p39_p0 = scmp.ne.s32.totalorder %s1143_s20, %s1139_s19 }
   0xf   : > { %p30_p1 = scmp.eq.s32.totalorder %s29_s26, 0  ;;  %p40_p2 = scmp.eq.s32.totalorder %s1147_s21, 0 }
  0x10   : > { %p45_p3 = scmp.ne.s32.totalorder %s1139_s19, %s1135_s18  ;;  %p163_p4 = scmp.eq.s32.totalorder %s1203_s22, 1 }
  0x11   : > { %s1219_s27 = scalar_select %p30_p1, %s1143_s20, %s32_s25  }
  0x12   : > { %p41_p5 = por %p40_p2, %p39_p0  ;;  %p1221_p6 = por %p163_p4, %p39_p0 }
  0x13   : > { %1411 = sst [smem:[#allocation17_spill]] %s1219_s27  ;;  %p169_p7 = scmp.eq.s32.totalorder %s739_s23, 1 }
  0x14   : > { %p911_p9 = scmp.lt.s32.totalorder %s1147_s21, 2  ;;  %s1403_s30 = sand.u32 1, %s1143_s20  }
  0x15   : > { %p1230_p10 = por %p169_p7, %p45_p3  ;;  %s1237_s6 = sshll.u32 %s1403_s30, 2 }
  0x16   : > { %s1240_s7 = sshll.u32 %s1147_s21, 2  ;;  %p1242_p11 = pnand %p911_p9, %p41_p5 }
  0x17   : > { %s225_s9 = sand.u32 1, %s1147_s21   ;;  %s1415_s1 = sld [smem:[#allocation18_spill]] }
  0x18   : > { %s229_s14 = scalar_lea.vmem [#allocation5], %s1237_s6  ;;  %s1252_s16 = scalar_lea.sflag [#allocation6], %s225_s9 }
  0x19   : > { %s237_s15 = sshll.u32 %s229_s14, 4  ;;  %p957_p13 = pneg %p1242_p11  ;;  %s238_s15 = int_to_ptr.vmem [resolvable:$true] %s237_s15 }
  0x1d   : > { %s233_s12 = scalar_lea.hbm %s1415_s1, %s1240_s7  ;;  %s960_s10 = scalar_lea.hbm %s1415_s1, 8 }
  0x1e   : > { %s235_s13 = sshll.u32 %s233_s12, 4  ;;  %s236_s13 = int_to_ptr.hbm [resolvable:$true] %s235_s13 }
  0x1f   : > { %s953_s17 = sshra.s32 %s236_s13, 4  ;;  %s954_s17 = int_to_ptr.hbm [resolvable:$true] %s953_s17 }
  0x20   : > { %s955_s23 = scalar_lea.hbm %s954_s17, 4  ;;  %p961_p2 = scmp.lt.s32.totalorder %s954_s17, %s1415_s1 }
  0x21   : > { %p956_p12 = scmp.ne.s32.totalorder %s954_s17, %s955_s23  ;;  %p962_p4 = scmp.lt.s32.totalorder %s960_s10, %s955_s23 }
  0x23   : > { %p958_p0 = pnand %p957_p13, %p956_p12  ;;  %p963_p5 = por %p962_p4, %p961_p2 }
  0x25   : > { %p959_p1 = pneg %p958_p0 }
  0x27   : > { %p964_p7 = pnand %p963_p5, %p959_p1 }
  0x29   : > { %967 = shalt.err (!%p964_p7)
}
  0x2a   : > { %902 = dma.hbm_to_vmem [thread:$0]  (!%p1242_p11), %s236_s13, 64, %s238_s15, %s1252_s16  }
  0x2b   : > { %p46_p9 = scmp.eq.s32.totalorder %s1203_s22, 0  ;;  %p740_p12 = scmp.ge.s32.totalorder %s1147_s21, 1 }
  0x2c   : > { %p176_p0 = scmp.lt.s32.totalorder %s1147_s21, 3  ;;  %s1416_s3 = sld [smem:[#allocation19_spill]] }
  0x2d   : > { %p1279_p1 = por %p46_p9, %p45_p3  ;;  %s1149_s13 = smov [#allocation8]  }
  0x2e   : > { %p1283_p2 = pnand %p740_p12, %p176_p0  ;;  %s189_s15 = sshll.u32 %s1149_s13, 4  ;;  %s190_s15 = int_to_ptr.vmem [resolvable:$true] %s189_s15 }
  0x2f   : > { %s214_s11 = scalar_lea.hbm %s1397_s0, %s1240_s7  ;;  %s210_s12 = scalar_lea.vmem [#allocation2], %s1237_s6 }
  0x30   : > { %p892_p4 = pneg %p1283_p2  ;;  %s218_s9 = sshll.u32 %s210_s12, 4  ;;  %s219_s9 = int_to_ptr.vmem [resolvable:$true] %s218_s9 }
  0x31   : > { %s216_s14 = sshll.u32 %s214_s11, 4  ;;  %s1150_s30 = smov 192   ;;  %s217_s14 = int_to_ptr.hbm [resolvable:$true] %s216_s14 }
  0x32   : > { %s187_s17 = sshll.u32 %s1416_s3, 4  ;;  %p893_p5 = pnand %p892_p4, %p46_p9  ;;  %s188_s17 = int_to_ptr.hbm [resolvable:$true] %s187_s17 }
  0x33   : > { %s1151_s1 = smov 12   ;;  %s1419_s3 = sand.u32 1, %s1143_s20  }
  0x34   : > { %895 = dma.hbm_to_vmem [thread:$0]  (!%p893_p5), %s188_s17, 3072, %s190_s15, [#allocation9], %s1150_s30, %s1150_s30, %s1151_s1  }
  0x35   : > { %s207_s13 = scalar_lea.sflag [#allocation3], %s1419_s3  ;;  %s1013_s27 = sshra.s32 %s217_s14, 4  ;;  %s1014_s27 = int_to_ptr.hbm [resolvable:$true] %s1013_s27 }
  0x36   : > { %s1015_s24 = scalar_lea.hbm %s1014_s27, 4  ;;  %s1020_s12 = scalar_lea.hbm %s1397_s0, 8 }
  0x37   : > { %p1016_p3 = scmp.ne.s32.totalorder %s1014_s27, %s1015_s24  ;;  %p1021_p0 = scmp.lt.s32.totalorder %s1014_s27, %s1397_s0 }
  0x38   : > { %p1022_p4 = scmp.lt.s32.totalorder %s1020_s12, %s1015_s24 }
  0x39   : > { %p1018_p7 = pnand %p1016_p3, %p957_p13 }
  0x3a   : > { %p1023_p5 = por %p1022_p4, %p1021_p0 }
  0x3b   : > { %p1019_p12 = pneg %p1018_p7 }
  0x3d   : > { %p1024_p8 = pnand %p1023_p5, %p1019_p12 }
  0x3f   : > { %1027 = shalt.err (!%p1024_p8)
}
  0x40   : > { %899 = dma.hbm_to_vmem [thread:$0]  (!%p1242_p11), %s217_s14, 64, %s219_s9, %s207_s13  }
  0x41   : > { %s252_s30 = scalar_lea.hbm %s1399_s2, %s1240_s7  ;;  %s248_s15 = scalar_lea.vmem [#allocation7], %s1237_s6 }
  0x42   : > { %s254_s17 = sshll.u32 %s252_s30, 4  ;;  %s256_s26 = sshll.u32 %s248_s15, 4  ;;  %s255_s17 = int_to_ptr.hbm [resolvable:$true] %s254_s17  ;;  %s257_s26 = int_to_ptr.vmem [resolvable:$true] %s256_s26 }
  0x43   : > { %s1043_s21 = sshra.s32 %s255_s17, 4  ;;  %s1050_s9 = scalar_lea.hbm %s1399_s2, 8  ;;  %s1044_s21 = int_to_ptr.hbm [resolvable:$true] %s1043_s21 }
  0x44   : > { %s1045_s24 = scalar_lea.hbm %s1044_s21, 4  ;;  %p1051_p12 = scmp.lt.s32.totalorder %s1044_s21, %s1399_s2 }
  0x45   : > { %p1046_p3 = scmp.ne.s32.totalorder %s1044_s21, %s1045_s24  ;;  %p1052_p0 = scmp.lt.s32.totalorder %s1050_s9, %s1045_s24 }
  0x47   : > { %p1048_p8 = pnand %p1046_p3, %p957_p13  ;;  %p1053_p4 = por %p1052_p0, %p1051_p12 }
  0x49   : > { %p1049_p7 = pneg %p1048_p8 }
  0x4b   : > { %p1054_p5 = pnand %p1053_p4, %p1049_p7 }
  0x4d   : > { %1057 = shalt.err (!%p1054_p5)
}
  0x4e   : > { %905 = dma.hbm_to_vmem [thread:$0]  (!%p1242_p11), %s255_s17, 64, %s257_s26, %s1252_s16  }
  0x4f   : > { %265 = sbr.rel (%p1283_p2) target bundleno = 664 (0x298), region = 40  ;;  %s1329_s6 = sand.u32 (!%p1283_p2), 1, %s1139_s19  }
  0x50   : > { %s1332_s7 = sshll.u32 (!%p1283_p2), %s1329_s6, 2  ;;  %s268_s12 = scalar_lea.sflag (!%p1283_p2), [#allocation3], %s1329_s6 }
  0x51   : > { %s271_s11 = scalar_lea.vmem (!%p1283_p2), [#allocation2], %s1332_s7 }
  0x54   : > { %1118 = dma.done.wait (%p1279_p1), %s268_s12, 64  }
  0x55   : > { %1120 = vsyncadd (%p1279_p1), %s268_s12, 4294967232  ;;  %s277_s8 = sand.u32 1, %s1203_s22   ;;  %s281_s25 = scalar_lea.vmem [#allocation5], %s1332_s7 }
  0x56   : > { %s278_s16 = scalar_lea.sflag [#allocation6], %s277_s8 }
  0x57   : > { %1122 = dma.done.wait (%p1279_p1), %s278_s16, 128  }
  0x58   : > { %1124 = vsyncadd (%p1279_p1), %s278_s16, 4294967168  ;;  %s291_s1 = scalar_lea.vmem [#allocation7], %s1332_s7 }
  0x59   : > { %1126 = dma.done.wait (%p46_p9), [#allocation9], 3072  }
  0x5a   : > { %1128 = vsyncadd (%p46_p9), [#allocation9], 4294964224  ;;  %v785_v0 = vld [vmem:[#allocation8 + $0xa8] sm:$0xf]  ;;  %v878_v1 = vld [vmem:[#allocation8 + $0xb0] sm:$0xf0] }
  0x5b   : > { %v877_v2 = vld [vmem:[#allocation8 + $0xac] sm:$0xf]  ;;  %v786_v3 = vor.u32 %v878_v1, %v785_v0  ;;  %v815_v4 = vld [vmem:[#allocation8 + $0xb4] sm:$0xf0]  ;;  %v781_v5 = vld [vmem:[#allocation8 + $0x90] sm:$0xf] }
  0x5c   : > { %v875_v6 = vld [vmem:[#allocation8 + $0x98] sm:$0xf0]  ;;  %v818_v7 = vor.u32 %v877_v2, %v815_v4  ;;  %v874_v8 = vld [vmem:[#allocation8 + $0x94] sm:$0xf]  ;;  %v811_v9 = vld [vmem:[#allocation8 + $0x9c] sm:$0xf0] }
  0x5d   : > { %417 = vmatpush.bf16.msra.mxu0 %v786_v3  ;;  %v782_v10 = vor.u32 %v875_v6, %v781_v5  ;;  %v814_v11 = vor.u32 %v874_v8, %v811_v9  ;;  %v777_v12 = vld [vmem:[#allocation8 + $0x78] sm:$0xf]  ;;  %v872_v13 = vld [vmem:[#allocation8 + $0x80] sm:$0xf0]  ;;  %v871_v14 = vld [vmem:[#allocation8 + $0x7c] sm:$0xf] }
  0x5e   : > { %467 = vmatpush.bf16.msra.mxu1 %v818_v7  ;;  %v807_v15 = vld [vmem:[#allocation8 + $0x84] sm:$0xf0]  ;;  %v778_v16 = vor.u32 %v872_v13, %v777_v12  ;;  %v773_v18 = vld [vmem:[#allocation8 + $0x60] sm:$0xf]  ;;  %v869_v19 = vld [vmem:[#allocation8 + $0x68] sm:$0xf0] }
  0x5f   : > { %v810_v17 = vor.u32 %v871_v14, %v807_v15  ;;  %v868_v20 = vld [vmem:[#allocation8 + $0x64] sm:$0xf]  ;;  %v803_v21 = vld [vmem:[#allocation8 + $0x6c] sm:$0xf0]  ;;  %v774_v22 = vor.u32 %v869_v19, %v773_v18  ;;  %v769_v24 = vld [vmem:[#allocation8 + $0x48] sm:$0xf] }
  0x60   : > { %v806_v23 = vor.u32 %v868_v20, %v803_v21  ;;  %v866_v25 = vld [vmem:[#allocation8 + $0x50] sm:$0xf0]  ;;  %v865_v26 = vld [vmem:[#allocation8 + $0x4c] sm:$0xf]  ;;  %v799_v27 = vld [vmem:[#allocation8 + $0x54] sm:$0xf0] }
  0x61   : > { %418 = vmatpush.bf16.msra.mxu0 %v782_v10  ;;  %v770_v28 = vor.u32 %v866_v25, %v769_v24  ;;  %v802_v29 = vor.u32 %v865_v26, %v799_v27  ;;  %v765_v30 = vld [vmem:[#allocation8 + $0x30] sm:$0xf]  ;;  %v863_v31 = vld [vmem:[#allocation8 + $0x38] sm:$0xf0]  ;;  %v862_v32 = vld [vmem:[#allocation8 + $0x34] sm:$0xf] }
  0x62   : > { %468 = vmatpush.bf16.msra.mxu1 %v814_v11  ;;  %v795_v33 = vld [vmem:[#allocation8 + $0x3c] sm:$0xf0]  ;;  %v766_v34 = vor.u32 %v863_v31, %v765_v30  ;;  %v761_v36 = vld [vmem:[#allocation8 + $0x18] sm:$0xf]  ;;  %v860_v37 = vld [vmem:[#allocation8 + $0x20] sm:$0xf0] }
  0x63   : > { %v798_v35 = vor.u32 %v862_v32, %v795_v33  ;;  %v859_v38 = vld [vmem:[#allocation8 + $0x1c] sm:$0xf]  ;;  %v791_v39 = vld [vmem:[#allocation8 + $0x24] sm:$0xf0]  ;;  %v762_v40 = vor.u32 %v860_v37, %v761_v36  ;;  %v757_v42 = vld [vmem:[#allocation8] sm:$0xf] }
  0x64   : > { %v794_v41 = vor.u32 %v859_v38, %v791_v39  ;;  %v857_v43 = vld [vmem:[#allocation8 + $0x8] sm:$0xf0]  ;;  %v856_v44 = vld [vmem:[#allocation8 + $0x4] sm:$0xf]  ;;  %v787_v45 = vld [vmem:[#allocation8 + $0xc] sm:$0xf0] }
  0x65   : > { %419 = vmatpush.bf16.msra.mxu0 %v778_v16  ;;  %v758_v46 = vor.u32 %v857_v43, %v757_v42  ;;  %v790_v47 = vor.u32 %v856_v44, %v787_v45  ;;  %v368_v48 = vld [vmem:[%s271_s11] sm:$0xf]  ;;  %v434_v49 = vld [vmem:[%s281_s25] sm:$0xf]  ;;  %v879_v51 = vld [vmem:[#allocation8 + $0xb8] sm:$0xf0] }
  0x66   : > { %469 = vmatpush.bf16.msra.mxu1 %v810_v17  ;;  %v849_v50 = vld [vmem:[#allocation8 + $0xb0] sm:$0xf]  ;;  %v845_v52 = vld [vmem:[#allocation8 + $0x98] sm:$0xf]  ;;  %v876_v54 = vld [vmem:[#allocation8 + $0xa0] sm:$0xf0] }
  0x67   : > { %v850_v53 = vor.u32 %v879_v51, %v849_v50  ;;  %v846_v55 = vor.u32 %v876_v54, %v845_v52  ;;  %v841_v56 = vld [vmem:[#allocation8 + $0x80] sm:$0xf]  ;;  %v873_v57 = vld [vmem:[#allocation8 + $0x88] sm:$0xf0]  ;;  %v837_v59 = vld [vmem:[#allocation8 + $0x68] sm:$0xf] }
  0x68   : > { %v842_v58 = vor.u32 %v873_v57, %v841_v56  ;;  %v870_v60 = vld [vmem:[#allocation8 + $0x70] sm:$0xf0]  ;;  %v367_v61 = vld [vmem:[%s1401_s4] sm:$0x7]  ;;  %v833_v63 = vld [vmem:[#allocation8 + $0x50] sm:$0xf] }
  0x69   : > { %420 = vmatpush.bf16.msra.mxu0 %v774_v22  ;;  %533 = vmatpush.bf16.msra.mxu2 %v850_v53  ;;  %v838_v62 = vor.u32 %v870_v60, %v837_v59  ;;  %v867_v0 = vld [vmem:[#allocation8 + $0x58] sm:$0xf0]  ;;  %v480_v1 = vrot.slane %v367_v61, 1  ;;  %v829_v3 = vld [vmem:[#allocation8 + $0x38] sm:$0xf]  ;;  %v431_v8 = vperm.slane %v367_v61, 0 }
  0x6a   : > { %470 = vmatpush.bf16.msra.mxu1 %v806_v23  ;;  %v834_v2 = vor.u32 %v867_v0, %v833_v63  ;;  %v864_v4 = vld [vmem:[#allocation8 + $0x40] sm:$0xf0]  ;;  %v825_v10 = vld [vmem:[#allocation8 + $0x20] sm:$0xf]  ;;  %v861_v11 = vld [vmem:[#allocation8 + $0x28] sm:$0xf0] }
  0x6b   : > { %v481_v5 = vperm.slane %v480_v1, 0  ;;  %v830_v7 = vor.u32 %v864_v4, %v829_v3  ;;  %v826_v14 = vor.u32 %v861_v11, %v825_v10  ;;  %v821_v16 = vld [vmem:[#allocation8 + $0x8] sm:$0xf]  ;;  %v858_v17 = vld [vmem:[#allocation8 + $0x10] sm:$0xf0]  ;;  %v546_v23 = vrot.slane %v367_v61, 2 }
  0x6c   : > { %v822_v19 = vor.u32 %v858_v17, %v821_v16  ;;  %v484_v22 = vld [vmem:[%s291_s1] sm:$0xf]  ;;  %vm566_vm0 = vcmask 64512   ;;  %vm580_vm1 = vcmask 1043456   ;;  %s853_s30 = sshll.u32 %s1203_s22, 3  ;;  %s754_s17 = sshll.u32 %s1329_s6, 3 }
  0x6d   : > { %421 = vmatpush.bf16.msra.mxu0 %v770_v28  ;;  %534 = vmatpush.bf16.msra.mxu2 %v846_v55  ;;  %v547_v24 = vperm.slane %v546_v23, 0  ;;  %s611_s21 = scalar_lea.hbm %s1402_s5, %s853_s30  ;;  %s333_s24 = scalar_lea.vmem [#allocation10], %s754_s17 }
  0x6e   : > { %471 = vmatpush.bf16.msra.mxu1 %v802_v29  ;;  %s613_s27 = sshll.u32 %s333_s24, 4  ;;  %s615_s10 = sshll.u32 %s611_s21, 4  ;;  %s614_s27 = int_to_ptr.vmem [resolvable:$true] %s613_s27  ;;  %s616_s10 = int_to_ptr.hbm [resolvable:$true] %s615_s10 }
  0x6f   : > { %s601_s9 = scalar_lea.sflag [#allocation4], %s1329_s6  ;;  %s1087_s14 = sshra.s32 %s616_s10, 4  ;;  %s1088_s14 = int_to_ptr.hbm [resolvable:$true] %s1087_s14 }
  0x70   : > { %s1089_s22 = scalar_lea.hbm %s1088_s14, 8  ;;  %s1093_s12 = scalar_lea.hbm %s1402_s5, 16 }
  0x71   : > { %422 = vmatpush.bf16.msra.mxu0 %v766_v34  ;;  %535 = vmatpush.bf16.msra.mxu2 %v842_v58  ;;  %p1090_p11 = scmp.ne.s32.totalorder %s1088_s14, %s1089_s22  ;;  %p1094_p1 = scmp.lt.s32.totalorder %s1088_s14, %s1402_s5 }
  0x72   : > { %472 = vmatpush.bf16.msra.mxu1 %v798_v35  ;;  %p1095_p2 = scmp.lt.s32.totalorder %s1093_s12, %s1089_s22 }
  0x73   : > { %p1091_p13 = pnand %p1090_p11, %p1221_p6 }
  0x74   : > { %p1096_p3 = por %p1095_p2, %p1094_p1 }
  0x75   : > { %423 = vmatpush.bf16.msra.mxu0 %v762_v40  ;;  %536 = vmatpush.bf16.msra.mxu2 %v838_v62  ;;  %p1092_p9 = pneg %p1091_p13 }
  0x76   : > { %473 = vmatpush.bf16.msra.mxu1 %v794_v41 }
  0x77   : > { %p1097_p8 = pnand %p1096_p3, %p1092_p9 }
  0x79   : > { %424 = vmatpush.bf16.msra.mxu0 %v758_v46  ;;  %537 = vmatpush.bf16.msra.mxu2 %v834_v2 }
  0x7a   : > { %474 = vmatpush.bf16.msra.mxu1 %v790_v47 }
  0x7c   : > { %425 = vmatmul.bf16.vlgmr.msra.gmra.mxu0 %v368_v48 }
  0x7d   : > { %475 = vmatmul.bf16.vlgmr.msra.gmra.mxu1 %v434_v49  ;;  %538 = vmatpush.bf16.msra.mxu2 %v830_v7 }
  0x81   : > { %539 = vmatpush.bf16.msra.mxu2 %v826_v14 }
  0x85   : > { %540 = vmatpush.bf16.msra.mxu2 %v822_v19 }
  0x88   : > { %541 = vmatmul.bf16.vlgmr.msra.gmra.mxu2 %v484_v22 }
  0xf9   : > { %v426_v6 = vpop.f32.mrf.mxu0 }
  0xfa   : > { %v476_v9 = vpop.f32.mrf.mxu1  ;;  %v433_v15 = vadd.f32 %v431_v8, %v426_v6 }
  0xfb   : > { %v483_v12 = vadd.f32 %v481_v5, %v476_v9 }
  0xfc   : > { %v550_v20 = vpack.c.bf16 %v433_v15, %v433_v15 }
  0xfd   : > { %v551_v13 = vpack.c.bf16 %v483_v12, %v483_v12 }
  0xff   : > { %560 = vmatpush.bf16.xpose.msra.mxu3 %v551_v13 }
 0x101   : > { %v428_v18 = vpop.f32.mrf.mxu0 }
 0x102   : > { %v478_v21 = vpop.f32.mrf.mxu1 }
 0x106   : > { %561 = vmatmul.bf16.vlgmr.msra.gmra.mxu3 %v550_v20 }
 0x10b   : > { %v542_v27 = vpop.f32.mrf.mxu2 }
 0x10c   : > { %v549_v28 = vadd.f32 %v547_v24, %v542_v27 }
 0x10e   : > { %v552_v29 = vpack.c.bf16 %v549_v28, %v549_v28 }
 0x110   : > { %v582_v30 = vsel %vm580_vm1, %v552_v29, 0 }
 0x111   : > { %591 = vmatpush.bf16.msrb.mxu3 %v582_v30 }
 0x113   : > { %v544_v32 = vpop.f32.mrf.mxu2 }
 0x189   : > { %v562_v25 = vpop.f32.mrf.mxu3 }
 0x18a   : > { %v567_v26 = vsel %vm566_vm0, %v562_v25, -inf }
 0x18b   : > { %568 = vmax.xlane.f32.xlu0 %v567_v26 }
 0x191   : > { %v564_v31 = vpop.f32.mrf.mxu3 }
 0x1fe   : > { %v569_v33 = vpop.xlane.xlu0 %568 }
 0x1ff   : > { %v570_v34 = vsub.f32 %v562_v25, %v569_v33 }
 0x201   : > { %v571_v35 = vmul.f32 1.442695, %v570_v34 }
 0x203   : > { %949 = vpow2.f32 %v571_v35 }
 0x209   : > { %v950_v36 = vpop.eup %949 }
 0x20a   : > { %v573_v37 = vsel %vm566_vm0, %v950_v36, 0.0  ;;  %v576_v38 = vpack.c.bf16 %v950_v36, %v950_v36 }
 0x20b   : > { %574 = vadd.xlane.f32.xlu0 %v573_v37 }
 0x20c   : > { %851 = vmatmul.msk.bf16.vlgmr.msrb.gmra.mxu3 %vm566_vm0, %v576_v38 }
 0x27e   : > { %v575_v39 = vpop.xlane.xlu0 %574 }
 0x27f   : > { %951 = vrcp.f32 %v575_v39 }
 0x285   : > { %v952_v40 = vpop.eup %951 }
 0x28f   : > { %v593_v41 = vpop.f32.mrf.mxu3 }
 0x290   : > { %v598_v42 = vmul.f32 %v952_v40, %v593_v41 }
 0x292   : > { %599 = vst [vmem:[%s333_s24] sm:$0xff] %v598_v42 }
 0x293   : > { %1100 = shalt.err (!%p1097_p8)
}
 0x294   : > { %890 = dma.vmem_to_hbm [thread:$0]  (%p1221_p6), %s614_s27, 128, %s616_s10, %s601_s9  }
 0x297   : > { %v595_v43 = vpop.f32.mrf.mxu3 }
 0x298 PF: > { %s1420_s6 = sld [smem:[#allocation15_spill]]  ;;  %s627_s16 = sand.u32 1, %s1135_s18  }
 0x299   : > { %s628_s25 = scalar_lea.sflag [#allocation4], %s627_s16 }
 0x29e   : > { %p1421_p7 = scmp.ge.s32.totalorder %s1420_s6, 2 }
 0x2a0   : > { %p907_p12 = pnand %p1421_p7, %p1230_p10 }
 0x2a2   : > { %p908_p0 = pneg %p907_p12 }
 0x2a4   : > { %1130 = dma.done.wait (%p908_p0), %s628_s25, 128  }
 0x2a5   : > { %1132 = vsyncadd (%p908_p0), %s628_s25, 4294967168  ;;  %s1422_s21 = sld [smem:[#allocation16_spill]]  ;;  %s1424_s18 = smov %s1139_s19 }
 0x2a6   : > { %s1423_s1 = sld [smem:[#allocation17_spill]]  ;;  %s1425_s19 = smov %s1143_s20 }
 0x2ab   : > { %p22_p4 = scmp.ge.s32.totalorder %s1422_s21, 4  }
 0x2ac   : > { %s1426_s20 = smov %s1423_s1 }
 0x2ad   :  { %24 = sbr.rel (!%p22_p4) target bundleno = 11 (0xb), region = 113 }
 0x2b2   :  { %634 = vsyncpa [#allocation3], 1 }
 0x2b3   :  { %636 = vsyncpa [#allocation3 + $0x1], 1 }
 0x2b4   :  { %637 = vsyncpa [#allocation6], 1 }
 0x2b5   :  { %639 = vsyncpa [#allocation6 + $0x1], 1 }
 0x2b6   :  { %640 = vsyncpa [#allocation9], 1 }
 0x2b7   :  { %641 = vsyncpa [#allocation4], 1 }
 0x2b8   :  { %643 = vsyncpa [#allocation4 + $0x1], 1 }

</bundles_post_ra>
